<compile_context>
chip_gen: v5e
topology: v5e:2x2
jax: 0.10.0
libtpu: 0.0.40
codegen_flags: <defaults>
</compile_context>

<pallas_src>
import jax
import jax.numpy as jnp
from jax.experimental import pallas as pl
from jax.experimental.pallas import tpu as pltpu

NEG_SLOPE = 0.01  # F.leaky_relu default negative_slope


def _round_up(x, m):
    return ((x + m - 1) // m) * m


def gd_mlp_kernel(x_ref, w1_ref, b1_ref, w2_ref, b2_ref, o_ref):
    # fc1: x is read f32 from HBM and cast to bf16 in-register (free; kernel
    # is HBM-bound, VALU/MXU have slack). Accumulate in f32 on the MXU.
    x = x_ref[...].astype(jnp.bfloat16)
    h = jnp.dot(x, w1_ref[...], preferred_element_type=jnp.float32)
    h = h + b1_ref[...]
    h = jnp.where(h > 0, h, NEG_SLOPE * h)  # leaky_relu in f32
    # fc2: cast activations to bf16 for the MXU, accumulate in f32.
    out = jnp.dot(h.astype(jnp.bfloat16), w2_ref[...],
                  preferred_element_type=jnp.float32)
    o_ref[...] = (out + b2_ref[...]).astype(o_ref.dtype)


def gd_mlp(x, w1, b1, w2, b2, *, batch_tile=2048):
    """x: (B, D_in) f32; w1: (D_in, H); b1: (H,); w2: (H, D_out); b2: (D_out,)."""
    B, D_in = x.shape
    H = w1.shape[1]
    D_out = w2.shape[1]

    # --- lane-dense output: pad fc2 output width to a multiple of 128 (tiny
    #     one-time pad of the fc2 weights/bias, not of any activation) ---
    D_pad = max(128, _round_up(D_out, 128))
    if D_pad != D_out:
        w2 = jnp.pad(w2, ((0, 0), (0, D_pad - D_out)))
        b2 = jnp.pad(b2, (0, D_pad - D_out))

    # --- bf16 MXU weight operands (one-time cast of tiny weights; biases f32) ---
    w1_bf16 = w1.astype(jnp.bfloat16)
    w2_bf16 = w2.astype(jnp.bfloat16)
    b1_2d = b1.reshape(1, H).astype(jnp.float32)
    b2_2d = b2.reshape(1, D_pad).astype(jnp.float32)

    # --- minimal batch padding: only to the f32 sublane multiple (8) ---
    B_pad = _round_up(B, 8)
    if B_pad != B:
        x = jnp.pad(x, ((0, B_pad - B), (0, 0)))

    # --- tile selection: big enough to amortize per-step overhead, small
    #     enough to keep >= ~4 grid steps for moderate B (v7x core split),
    #     never larger than the (padded) batch itself. Always a multiple of 8.
    tm = min(batch_tile, _round_up(pl.cdiv(B_pad, 4), 16), B_pad)
    grid = (pl.cdiv(B_pad, tm),)

    # cost estimate: only what this pallas_call itself touches.
    flops = 2 * B_pad * (D_in * H + H * D_pad)
    bytes_accessed = (B_pad * D_in * 4          # x read (f32)
                      + D_in * H * 2 + H * 4    # w1 (bf16) + b1 (f32)
                      + H * D_pad * 2 + D_pad * 4   # w2 (bf16) + b2 (f32)
                      + B_pad * D_pad * 4)      # output write (f32)

    out = pl.pallas_call(
        gd_mlp_kernel,
        out_shape=jax.ShapeDtypeStruct((B_pad, D_pad), jnp.float32),
        grid=grid,
        in_specs=[
            pl.BlockSpec((tm, D_in), lambda i: (i, 0)),    # x tile marches over batch
            pl.BlockSpec((D_in, H), lambda i: (0, 0)),     # w1 resident
            pl.BlockSpec((1, H), lambda i: (0, 0)),        # b1 resident
            pl.BlockSpec((H, D_pad), lambda i: (0, 0)),    # w2 resident
            pl.BlockSpec((1, D_pad), lambda i: (0, 0)),    # b2 resident
        ],
        out_specs=pl.BlockSpec((tm, D_pad), lambda i: (i, 0)),
        compiler_params=pltpu.CompilerParams(
            dimension_semantics=("parallel",),             # rows split across TCs on v7x
            vmem_limit_bytes=32 * 1024 * 1024),
        cost_estimate=pl.CostEstimate(flops=flops, transcendentals=0,
                                      bytes_accessed=bytes_accessed),
    )(x, w1_bf16, b1_2d, w2_bf16, b2_2d)

    # TODO(synk): consumers that can read the padded (B, 128) slab directly
    # would skip this extra HBM pass; kept for an exact (B, D_out) interface.
    return out[:B, :D_out]


def reference_f32(x, w1, b1, w2, b2):
    h = x @ w1 + b1
    h = jnp.where(h > 0, h, NEG_SLOPE * h)
    return h @ w2 + b2


def reference_bf16(x, w1, b1, w2, b2):
    # Mirrors the kernel's bf16-input / f32-accumulate arithmetic.
    h = jnp.dot(x.astype(jnp.bfloat16), w1.astype(jnp.bfloat16),
                preferred_element_type=jnp.float32) + b1
    h = jnp.where(h > 0, h, NEG_SLOPE * h)
    return jnp.dot(h.astype(jnp.bfloat16), w2.astype(jnp.bfloat16),
                   preferred_element_type=jnp.float32) + b2


if __name__ == "__main__":
    key = jax.random.PRNGKey(0)
    B, D_in, H, D_out = 8, 512, 128, 2

    kx, k1, k2, k3, k4 = jax.random.split(key, 5)
    x = jax.random.normal(kx, (B, D_in), dtype=jnp.float32)

    # PyTorch-style params: fc1.weight (H, D_in), fc1.bias (H,), etc.
    bound1 = 1.0 / (D_in ** 0.5)
    fc1_w = jax.random.uniform(k1, (H, D_in), minval=-bound1, maxval=bound1,
                               dtype=jnp.float32)
    fc1_b = jax.random.uniform(k2, (H,), minval=-bound1, maxval=bound1,
                               dtype=jnp.float32)
    bound2 = 1.0 / (H ** 0.5)
    fc2_w = jax.random.uniform(k3, (D_out, H), minval=-bound2, maxval=bound2,
                               dtype=jnp.float32)
    fc2_b = jax.random.uniform(k4, (D_out,), minval=-bound2, maxval=bound2,
                               dtype=jnp.float32)

    # Transpose to (in, out) layout for the kernel.
    w1 = fc1_w.T
    w2 = fc2_w.T

    out = gd_mlp(x, w1, fc1_b, w2, fc2_b)
    out = jax.block_until_ready(out)
    assert out.shape == (B, D_out), out.shape

    # Tight check vs. a reference that uses the same bf16/f32 arithmetic.
    ref_mixed = reference_bf16(x, w1, fc1_b, w2, fc2_b)
    assert jnp.allclose(out, ref_mixed, atol=1e-2, rtol=1e-2), "mismatch vs bf16 reference"

    # Loose check vs. the pure-f32 PyTorch-equivalent forward.
    ref_f32 = reference_f32(x, w1, fc1_b, w2, fc2_b)
    assert jnp.allclose(out, ref_f32, atol=5e-2, rtol=5e-2), "mismatch vs f32 reference"

    print("KERNEL_OK")
</pallas_src>

<mosaic_0001>
module attributes {stable_mosaic.version = 11 : i64} {
  func.func @gd_mlp_kernel(%arg0: i32, %arg1: memref<8x512xf32, #tpu.memory_space<vmem>>, %arg2: memref<512x128xbf16, #tpu.memory_space<vmem>>, %arg3: memref<1x128xf32, #tpu.memory_space<vmem>>, %arg4: memref<128x128xbf16, #tpu.memory_space<vmem>>, %arg5: memref<1x128xf32, #tpu.memory_space<vmem>>, %arg6: memref<8x128xf32, #tpu.memory_space<vmem>>) attributes {dimension_semantics = [#tpu.dimension_semantics<parallel>], iteration_bounds = array<i64: 1>, scalar_prefetch = 0 : i64, scratch_operands = 0 : i64, tpu.core_type = #tpu.core_type<tc>, window_params = [{transform_indices = @transform_0, window_bounds = array<i64: 8, 512>}, {pipeline_mode = #tpu.pipeline_mode<synchronous>, transform_indices = @transform_1, window_bounds = array<i64: 512, 128>}, {pipeline_mode = #tpu.pipeline_mode<synchronous>, transform_indices = @transform_2, window_bounds = array<i64: 1, 128>}, {pipeline_mode = #tpu.pipeline_mode<synchronous>, transform_indices = @transform_3, window_bounds = array<i64: 128, 128>}, {pipeline_mode = #tpu.pipeline_mode<synchronous>, transform_indices = @transform_4, window_bounds = array<i64: 1, 128>}, {transform_indices = @transform_5, window_bounds = array<i64: 8, 128>}]} {
    %c0 = arith.constant 0 : index
    %c0_0 = arith.constant 0 : index
    %0 = vector.load %arg1[%c0, %c0_0] : memref<8x512xf32, #tpu.memory_space<vmem>>, vector<8x512xf32>
    %1 = arith.truncf %0 : vector<8x512xf32> to vector<8x512xbf16>
    %c0_1 = arith.constant 0 : index
    %c0_2 = arith.constant 0 : index
    %2 = vector.load %arg2[%c0_1, %c0_2] : memref<512x128xbf16, #tpu.memory_space<vmem>>, vector<512x128xbf16>
    %cst = arith.constant dense<0.000000e+00> : vector<8x128xf32>
    %3 = tpu.matmul %1, %2, %cst {dimension_numbers = #tpu.dot_dimension_numbers<[1], [0], [0], [1], [0, 0, 1, 1], [], []>} : vector<8x512xbf16>, vector<512x128xbf16>, vector<8x128xf32> -> vector<8x128xf32>
    %c0_3 = arith.constant 0 : index
    %c0_4 = arith.constant 0 : index
    %4 = vector.load %arg3[%c0_3, %c0_4] : memref<1x128xf32, #tpu.memory_space<vmem>>, vector<1x128xf32>
    %5 = vector.broadcast %4 : vector<1x128xf32> to vector<8x128xf32>
    %6 = arith.addf %3, %5 : vector<8x128xf32>
    %cst_5 = arith.constant 0.000000e+00 : f32
    %7 = vector.broadcast %cst_5 : f32 to vector<8x128xf32>
    %8 = arith.cmpf ogt, %6, %7 : vector<8x128xf32>
    %cst_6 = arith.constant 0.00999999977 : f32
    %9 = vector.broadcast %cst_6 : f32 to vector<8x128xf32>
    %10 = arith.mulf %9, %6 : vector<8x128xf32>
    %11 = arith.select %8, %6, %10 : vector<8x128xi1>, vector<8x128xf32>
    %12 = arith.truncf %11 : vector<8x128xf32> to vector<8x128xbf16>
    %c0_7 = arith.constant 0 : index
    %c0_8 = arith.constant 0 : index
    %13 = vector.load %arg4[%c0_7, %c0_8] : memref<128x128xbf16, #tpu.memory_space<vmem>>, vector<128x128xbf16>
    %cst_9 = arith.constant dense<0.000000e+00> : vector<8x128xf32>
    %14 = tpu.matmul %12, %13, %cst_9 {dimension_numbers = #tpu.dot_dimension_numbers<[1], [0], [0], [1], [0, 0, 1, 1], [], []>} : vector<8x128xbf16>, vector<128x128xbf16>, vector<8x128xf32> -> vector<8x128xf32>
    %c0_10 = arith.constant 0 : index
    %c0_11 = arith.constant 0 : index
    %15 = vector.load %arg5[%c0_10, %c0_11] : memref<1x128xf32, #tpu.memory_space<vmem>>, vector<1x128xf32>
    %16 = vector.broadcast %15 : vector<1x128xf32> to vector<8x128xf32>
    %17 = arith.addf %14, %16 : vector<8x128xf32>
    %c0_12 = arith.constant 0 : index
    %c0_13 = arith.constant 0 : index
    %18 = vector.load %arg6[%c0_12, %c0_13] : memref<8x128xf32, #tpu.memory_space<vmem>>, vector<8x128xf32>
    tpu.vector_store %arg6[%c0_12, %c0_13], %17 {strides = array<i32>} : memref<8x128xf32, #tpu.memory_space<vmem>>, vector<8x128xf32>,
    return
  }
  func.func @transform_0(%arg0: i32) -> (i32, i32) {
    %c0_i32 = arith.constant 0 : i32
    %c0_i32_0 = arith.constant 0 : i32
    return %arg0, %c0_i32 : i32, i32
  }
  func.func @transform_1(%arg0: i32) -> (i32, i32) {
    %c0_i32 = arith.constant 0 : i32
    %c0_i32_0 = arith.constant 0 : i32
    %c0_i32_1 = arith.constant 0 : i32
    return %c0_i32, %c0_i32_0 : i32, i32
  }
  func.func @transform_2(%arg0: i32) -> (i32, i32) {
    %c0_i32 = arith.constant 0 : i32
    %c0_i32_0 = arith.constant 0 : i32
    %c0_i32_1 = arith.constant 0 : i32
    return %c0_i32, %c0_i32_0 : i32, i32
  }
  func.func @transform_3(%arg0: i32) -> (i32, i32) {
    %c0_i32 = arith.constant 0 : i32
    %c0_i32_0 = arith.constant 0 : i32
    %c0_i32_1 = arith.constant 0 : i32
    return %c0_i32, %c0_i32_0 : i32, i32
  }
  func.func @transform_4(%arg0: i32) -> (i32, i32) {
    %c0_i32 = arith.constant 0 : i32
    %c0_i32_0 = arith.constant 0 : i32
    %c0_i32_1 = arith.constant 0 : i32
    return %c0_i32, %c0_i32_0 : i32, i32
  }
  func.func @transform_5(%arg0: i32) -> (i32, i32) {
    %c0_i32 = arith.constant 0 : i32
    %c0_i32_0 = arith.constant 0 : i32
    return %arg0, %c0_i32 : i32, i32
  }
}

</mosaic_0001>

<bundles_post_ra>
// kernel: tpu_custom_call.1
= control target key start
LH: loop header
LB: loop body
LE: loop exit
PB: predicated region body
PF: predicated region fallthrough
CT: control target
= control target key end

     0   :  { %10 = vsyncpa [#allocation3], 0  ;;  %s854_s0 = inlined_call_operand.hbm [shape: f32[8,512], index: 0, kind: input, shape index: {}]   ;;  %s855_s1 = inlined_call_operand.hbm [shape: bf16[512,128], index: 1, kind: input, shape index: {}]   ;;  %s856_s2 = inlined_call_operand.vmem [shape: f32[1,128], index: 2, kind: input, shape index: {}]   ;;  %s857_s3 = inlined_call_operand.hbm [shape: bf16[128,128], index: 3, kind: input, shape index: {}]   ;;  %s858_s4 = inlined_call_operand.vmem [shape: f32[1,128], index: 4, kind: input, shape index: {}]   ;;  %s859_s5 = inlined_call_operand.hbm [shape: f32[8,128], index: 5, kind: output, shape index: {}]  }
   0x1   :  { %11 = vsyncpa [#allocation6], 0  ;;  %s28_s20 = sshll.u32 %s855_s1, 4  ;;  %s29_s20 = int_to_ptr.hbm [resolvable:$true] %s28_s20 }
   0x2   :  { %12 = vsyncpa [#allocation4], 0  ;;  %s800_s21 = smov [#allocation5]   ;;  %s18_s25 = sshll.u32 %s854_s0, 4  ;;  %s19_s25 = int_to_ptr.hbm [resolvable:$true] %s18_s25 }
   0x3   :  { %s30_s22 = sshll.u32 %s800_s21, 4  ;;  %s801_s26 = smov 64   ;;  %s31_s22 = int_to_ptr.vmem [resolvable:$true] %s30_s22 }
   0x4   :  { %s802_s27 = smov 4   ;;  %s803_s28 = smov [#allocation2]  }
   0x5   :  { %36 = dma.hbm_to_vmem [thread:$0]  %s29_s20, 4096, %s31_s22, [#allocation6], %s801_s26, %s801_s26, %s802_s27  }
   0x6   :  { %s20_s29 = sshll.u32 %s803_s28, 4  ;;  %s43_s7 = sshll.u32 %s857_s3, 4  ;;  %s21_s29 = int_to_ptr.vmem [resolvable:$true] %s20_s29  ;;  %s44_s7 = int_to_ptr.hbm [resolvable:$true] %s43_s7 }
   0x7   :  { %23 = dma.hbm_to_vmem [thread:$0]  %s19_s25, 512, %s21_s29, [#allocation3]  }
   0x8   :  { %s804_s1 = smov [#allocation7]  }
   0x9   :  { %s45_s8 = sshll.u32 %s804_s1, 4  ;;  %s46_s8 = int_to_ptr.vmem [resolvable:$true] %s45_s8 }
   0xa   :  { %51 = dma.hbm_to_vmem [thread:$0]  %s44_s7, 1024, %s46_s8, [#allocation6], %s801_s26, %s801_s26, %s802_s27  }
   0xb   :  { %794 = dma.done.wait [#allocation3], 512  }
   0xc   :  { %795 = vsyncadd [#allocation3], 4294966784 }
   0xd   :  { %796 = dma.done.wait [#allocation6], 5120  }
   0xe   :  { %797 = vsyncadd [#allocation6], 4294962176  ;;  %v657_v0 = vld [vmem:[#allocation5 + $0x38] sm:$0xff]  ;;  %v656_v4 = vld [vmem:[#allocation5 + $0x30] sm:$0xff]  ;;  %s479_s14 = sshll.u32 %s859_s5, 4  ;;  %s480_s14 = int_to_ptr.hbm [resolvable:$true] %s479_s14 }
   0xf   :  { %v665_v1 = vld [vmem:[#allocation5 + $0x78] sm:$0xff]  ;;  %334 = vmatpush.bf16.msra.mxu0 %v657_v0  ;;  %v664_v5 = vld [vmem:[#allocation5 + $0x70] sm:$0xff]  ;;  %v655_v8 = vld [vmem:[#allocation5 + $0x28] sm:$0xff] }
  0x10   :  { %v673_v2 = vld [vmem:[#allocation5 + $0xb8] sm:$0xff]  ;;  %347 = vmatpush.bf16.msra.mxu1 %v665_v1  ;;  %v672_v6 = vld [vmem:[#allocation5 + $0xb0] sm:$0xff]  ;;  %v663_v9 = vld [vmem:[#allocation5 + $0x68] sm:$0xff] }
  0x11   :  { %v681_v3 = vld [vmem:[#allocation5 + $0xf8] sm:$0xff]  ;;  %360 = vmatpush.bf16.msra.mxu2 %v673_v2  ;;  %v680_v7 = vld [vmem:[#allocation5 + $0xf0] sm:$0xff]  ;;  %v671_v10 = vld [vmem:[#allocation5 + $0xa8] sm:$0xff] }
  0x12   :  { %373 = vmatpush.bf16.msra.mxu3 %v681_v3  ;;  %v679_v11 = vld [vmem:[#allocation5 + $0xe8] sm:$0xff]  ;;  %v654_v12 = vld [vmem:[#allocation5 + $0x20] sm:$0xff]  ;;  %v653_v16 = vld [vmem:[#allocation5 + $0x18] sm:$0xff] }
  0x13   :  { %335 = vmatpush.bf16.msra.mxu0 %v656_v4  ;;  %v662_v13 = vld [vmem:[#allocation5 + $0x60] sm:$0xff]  ;;  %v661_v17 = vld [vmem:[#allocation5 + $0x58] sm:$0xff]  ;;  %v652_v20 = vld [vmem:[#allocation5 + $0x10] sm:$0xff] }
  0x14   :  { %348 = vmatpush.bf16.msra.mxu1 %v664_v5  ;;  %v670_v14 = vld [vmem:[#allocation5 + $0xa0] sm:$0xff]  ;;  %v669_v18 = vld [vmem:[#allocation5 + $0x98] sm:$0xff]  ;;  %v660_v21 = vld [vmem:[#allocation5 + $0x50] sm:$0xff] }
  0x15   :  { %361 = vmatpush.bf16.msra.mxu2 %v672_v6  ;;  %v678_v15 = vld [vmem:[#allocation5 + $0xe0] sm:$0xff]  ;;  %v677_v19 = vld [vmem:[#allocation5 + $0xd8] sm:$0xff]  ;;  %v668_v22 = vld [vmem:[#allocation5 + $0x90] sm:$0xff] }
  0x16   :  { %374 = vmatpush.bf16.msra.mxu3 %v680_v7  ;;  %v676_v23 = vld [vmem:[#allocation5 + $0xd0] sm:$0xff]  ;;  %v651_v24 = vld [vmem:[#allocation5 + $0x8] sm:$0xff]  ;;  %v650_v28 = vld [vmem:[#allocation5] sm:$0xff] }
  0x17   :  { %336 = vmatpush.bf16.msra.mxu0 %v655_v8  ;;  %v659_v25 = vld [vmem:[#allocation5 + $0x48] sm:$0xff]  ;;  %v658_v29 = vld [vmem:[#allocation5 + $0x40] sm:$0xff]  ;;  %v68_v34 = vld [vmem:[#allocation2 + $0x10] sm:$0xff] }
  0x18   :  { %349 = vmatpush.bf16.msra.mxu1 %v663_v9  ;;  %v667_v26 = vld [vmem:[#allocation5 + $0x88] sm:$0xff]  ;;  %v666_v30 = vld [vmem:[#allocation5 + $0x80] sm:$0xff]  ;;  %v69_v35 = vld [vmem:[#allocation2 + $0x18] sm:$0xff]  ;;  %v72_v39 = vpack.c.bf16 %v68_v34, %v68_v34 }
  0x19   :  { %362 = vmatpush.bf16.msra.mxu2 %v671_v10  ;;  %v675_v27 = vld [vmem:[#allocation5 + $0xc8] sm:$0xff]  ;;  %v66_v31 = vld [vmem:[#allocation2] sm:$0xff]  ;;  %v689_v36 = vld [vmem:[#allocation7 + $0x38] sm:$0xff]  ;;  %v73_v40 = vpack.c.bf16 %v69_v35, %v69_v35 }
  0x1a   :  { %375 = vmatpush.bf16.msra.mxu3 %v679_v11  ;;  %v67_v32 = vld [vmem:[#allocation2 + $0x8] sm:$0xff]  ;;  %v674_v33 = vld [vmem:[#allocation5 + $0xc0] sm:$0xff]  ;;  %v70_v37 = vpack.c.bf16 %v66_v31, %v66_v31  ;;  %v688_v41 = vld [vmem:[#allocation7 + $0x30] sm:$0xff] }
  0x1b   :  { %337 = vmatpush.bf16.msra.mxu0 %v654_v12  ;;  %v71_v38 = vpack.c.bf16 %v67_v32, %v67_v32  ;;  %v687_v42 = vld [vmem:[#allocation7 + $0x28] sm:$0xff]  ;;  %v686_v43 = vld [vmem:[#allocation7 + $0x20] sm:$0xff]  ;;  %v685_v44 = vld [vmem:[#allocation7 + $0x18] sm:$0xff] }
  0x1c   :  { %350 = vmatpush.bf16.msra.mxu1 %v662_v13  ;;  %v684_v45 = vld [vmem:[#allocation7 + $0x10] sm:$0xff]  ;;  %v683_v46 = vld [vmem:[#allocation7 + $0x8] sm:$0xff]  ;;  %v682_v47 = vld [vmem:[#allocation7] sm:$0xff] }
  0x1d   :  { %363 = vmatpush.bf16.msra.mxu2 %v670_v14  ;;  %v696_v48 = vld [vmem:[%s856_s2] ss:$0 sm:$0xff]  ;;  %s805_s2 = smov [#allocation8]  }
  0x1e   :  { %376 = vmatpush.bf16.msra.mxu3 %v678_v15  ;;  %v697_v0 = vld [vmem:[%s858_s4] ss:$0 sm:$0xff]  ;;  %s477_s11 = sshll.u32 %s805_s2, 4  ;;  %s478_s11 = int_to_ptr.vmem [resolvable:$true] %s477_s11 }
  0x1f   :  { %338 = vmatpush.bf16.msra.mxu0 %v653_v16 }
  0x20   :  { %351 = vmatpush.bf16.msra.mxu1 %v661_v17 }
  0x21   :  { %364 = vmatpush.bf16.msra.mxu2 %v669_v18 }
  0x22   :  { %377 = vmatpush.bf16.msra.mxu3 %v677_v19 }
  0x23   :  { %339 = vmatpush.bf16.msra.mxu0 %v652_v20 }
  0x24   :  { %352 = vmatpush.bf16.msra.mxu1 %v660_v21 }
  0x25   :  { %365 = vmatpush.bf16.msra.mxu2 %v668_v22 }
  0x26   :  { %378 = vmatpush.bf16.msra.mxu3 %v676_v23 }
  0x27   :  { %340 = vmatpush.bf16.msra.mxu0 %v651_v24 }
  0x28   :  { %353 = vmatpush.bf16.msra.mxu1 %v659_v25 }
  0x29   :  { %366 = vmatpush.bf16.msra.mxu2 %v667_v26 }
  0x2a   :  { %379 = vmatpush.bf16.msra.mxu3 %v675_v27 }
  0x2b   :  { %341 = vmatpush.bf16.msra.mxu0 %v650_v28 }
  0x2c   :  { %354 = vmatpush.bf16.msra.mxu1 %v658_v29 }
  0x2d   :  { %367 = vmatpush.bf16.msra.mxu2 %v666_v30 }
  0x2e   :  { %380 = vmatpush.bf16.msra.mxu3 %v674_v33  ;;  %342 = vmatmul.bf16.vlgmr.msra.gmra.mxu0 %v70_v37 }
  0x2f   :  { %458 = vmatpush.bf16.msrb.mxu0 %v689_v36  ;;  %355 = vmatmul.bf16.vlgmr.msra.gmra.mxu1 %v71_v38 }
  0x30   :  { %368 = vmatmul.bf16.vlgmr.msra.gmra.mxu2 %v72_v39 }
  0x31   :  { %381 = vmatmul.bf16.vlgmr.msra.gmra.mxu3 %v73_v40 }
  0x33   :  { %459 = vmatpush.bf16.msrb.mxu0 %v688_v41 }
  0x37   :  { %460 = vmatpush.bf16.msrb.mxu0 %v687_v42 }
  0x3b   :  { %461 = vmatpush.bf16.msrb.mxu0 %v686_v43 }
  0x3f   :  { %462 = vmatpush.bf16.msrb.mxu0 %v685_v44 }
  0x43   :  { %463 = vmatpush.bf16.msrb.mxu0 %v684_v45 }
  0x47   :  { %464 = vmatpush.bf16.msrb.mxu0 %v683_v46 }
  0x4b   :  { %465 = vmatpush.bf16.msrb.mxu0 %v682_v47 }
  0xab   :  { %v343_v49 = vpop.f32.mrf.mxu0 }
  0xac   :  { %v356_v50 = vpop.f32.mrf.mxu1  ;;  %v344_v51 = vadd.f32 %v696_v48, %v343_v49 }
  0xae   :  { %v357_v52 = vadd.f32 %v356_v50, %v344_v51 }
  0xb3   :  { %v369_v53 = vpop.f32.mrf.mxu2  ;;  %v345_v56 = vpop.f32.mrf.mxu0 }
  0xb4   :  { %v382_v54 = vpop.f32.mrf.mxu3  ;;  %v370_v55 = vadd.f32 %v369_v53, %v357_v52  ;;  %v358_v57 = vpop.f32.mrf.mxu1 }
  0xb6   :  { %v383_v58 = vadd.f32 %v382_v54, %v370_v55 }
  0xb8   :  { %vm386_vm0 = vcmp.gt.f32.partialorder %v383_v58, 0.0  ;;  %v387_v59 = vmul.f32 0.01, %v383_v58 }
  0xba   :  { %v388_v60 = vsel %vm386_vm0, %v383_v58, %v387_v59 }
  0xbb   :  { %v371_v61 = vpop.f32.mrf.mxu2  ;;  %v389_v63 = vpack.c.bf16 %v388_v60, %v388_v60 }
  0xbc   :  { %v384_v62 = vpop.f32.mrf.mxu3 }
  0xbd   :  { %466 = vmatmul.bf16.vlgmr.msrb.gmra.mxu0 %v389_v63 }
 0x13a   :  { %v467_v1 = vpop.f32.mrf.mxu0 }
 0x13b   :  { %v468_v2 = vadd.f32 %v697_v0, %v467_v1 }
 0x13d   :  { %471 = vst [vmem:[#allocation8] sm:$0xff] %v468_v2 }
 0x13e   :  { %482 = dma.vmem_to_hbm [thread:$0]  %s478_s11, 128, %s480_s14, [#allocation4]  }
 0x142   :  { %v469_v3 = vpop.f32.mrf.mxu0 }
 0x143   :  { %798 = dma.done.wait [#allocation4], 128  }
 0x144   :  { %799 = vsyncadd [#allocation4], 4294967168 }
 0x145   :  { %487 = vsyncpa [#allocation3], 1 }
 0x146   :  { %488 = vsyncpa [#allocation6], 1 }
 0x147   :  { %489 = vsyncpa [#allocation4], 1 }

</bundles_post_ra>
